<compile_context>
chip_gen: v7x
topology: tpu7x:2x2x1
jax: 0.10.0
libtpu: 0.0.40
codegen_flags: <defaults>
</compile_context>

<pallas_src>
import functools

import jax
import jax.numpy as jnp
from jax.experimental import pallas as pl
from jax.experimental.pallas import tpu as pltpu


def _cca_kernel(xre_ref, xim_ref, b1_ref, b2_ref, out_ref,
                sre_acc, sim_acc, mre_acc, mim_acc,
                *, inv_hw, chunk, n_chunks, bt):
    k = pl.program_id(1)

    # --- init accumulators at the first spatial tile -------------------------
    @pl.when(k == 0)
    def _init():
        sre_acc[...] = jnp.zeros_like(sre_acc)
        sim_acc[...] = jnp.zeros_like(sim_acc)
        mre_acc[...] = jnp.full_like(mre_acc, -jnp.inf)
        mim_acc[...] = jnp.full_like(mim_acc, -jnp.inf)

    # --- chunked VPU accumulation of sum & max over this spatial tile --------
    # One fused pass over the data; cross-lane (XLU) reduction is deferred to a
    # single O(C * chunk) reduce at finalize.
    sre = sre_acc[...]
    sim = sim_acc[...]
    mre = mre_acc[...]
    mim = mim_acc[...]
    for c in range(n_chunks):              # static, fully unrolled
        off = c * chunk
        xr = xre_ref[:, :, pl.ds(off, chunk)].astype(jnp.float32)
        xi = xim_ref[:, :, pl.ds(off, chunk)].astype(jnp.float32)
        sre = sre + xr
        sim = sim + xi
        mre = jnp.maximum(mre, xr)
        mim = jnp.maximum(mim, xi)
    sre_acc[...] = sre
    sim_acc[...] = sim
    mre_acc[...] = mre
    mim_acc[...] = mim

    # --- finalize: one XLU reduce, block-structured complex fc, sigmoid ------
    @pl.when(k == pl.num_programs(1) - 1)
    def _finalize():
        avg_re = jnp.sum(sre_acc[...], axis=-1) * inv_hw      # (Bt, C)
        avg_im = jnp.sum(sim_acc[...], axis=-1) * inv_hw
        max_re = jnp.max(mre_acc[...], axis=-1)
        max_im = jnp.max(mim_acc[...], axis=-1)

        # Stack [avg; max] rows, concat [re | im] on lanes.
        p = jnp.concatenate(
            [jnp.concatenate([avg_re, avg_im], axis=-1),
             jnp.concatenate([max_re, max_im], axis=-1)],
            axis=0)                                            # (2*Bt, 2C)

        # complex conv1 (C -> Cmid) as one real matmul with block weights
        h = jnp.dot(p, b1_ref[...], preferred_element_type=jnp.float32)
        h = jnp.maximum(h, 0.0)                                # ComplexReLU
        # complex conv2 (Cmid -> C)
        y = jnp.dot(h, b2_ref[...], preferred_element_type=jnp.float32)

        s = y[:bt, :] + y[bt:, :]                              # avg + max paths
        out_ref[...] = jax.nn.sigmoid(s)[:, None, :]           # (Bt, 1, 2C)


def _pick_tiles(B, C, HW, itemsize):
    """Choose (batch_tile, spatial_tile) under a conservative VMEM budget."""
    # Budget for the two double-buffered x inputs (re & im); conservative so the
    # same tiling fits v5e/v6e (128 MiB VMEM) and v7x (64 MiB VMEM).
    budget = 24 * 1024 * 1024

    # Batch tile: keep batch grid extent >= 2 when possible (v7x has 2 TCs and
    # shards the leading "parallel" grid axis across them).
    bt = B
    for cand in (8, 4, 2, 1):
        if B % cand == 0 and B // cand >= 2:
            bt = cand
            break

    # Spatial (lane) tile: largest multiple-of-128 divisor of HW within budget;
    # fall back to the whole spatial extent if HW has no such divisor.
    if HW % 128 == 0:
        tile_hw = 128
        for cand in (4096, 2048, 1024, 512, 256):
            if HW % cand == 0 and 2 * 2 * bt * C * cand * itemsize <= budget:
                tile_hw = cand
                break
    else:
        tile_hw = HW
    return bt, tile_hw


def complex_channel_attention(x_re, x_im, w1_re, w1_im, w2_re, w2_im):
    """x_*: [B, C, H, W]; w1_*: [Cmid, C]; w2_*: [C, Cmid].

    Returns complex64 of shape [B, C, 1, 1] (as the PyTorch module would on a
    complex input tensor).
    """
    B, C, H, W = x_re.shape
    HW = H * W
    Cmid = w1_re.shape[0]

    # Stream x in its native dtype (bf16 OK); accumulation is f32 in-kernel.
    xre = x_re.reshape(B, C, HW)
    xim = x_im.reshape(B, C, HW)

    # Block-structured real weights for the complex 1x1 convs, pre-transposed
    # to (in, out):  [p_re | p_im] @ [[Wr^T, Wi^T], [-Wi^T, Wr^T]] = [h_re | h_im]
    w1re_t = jnp.transpose(w1_re).astype(jnp.float32)   # (C, Cmid)
    w1im_t = jnp.transpose(w1_im).astype(jnp.float32)
    w2re_t = jnp.transpose(w2_re).astype(jnp.float32)   # (Cmid, C)
    w2im_t = jnp.transpose(w2_im).astype(jnp.float32)
    b1 = jnp.concatenate(
        [jnp.concatenate([w1re_t, w1im_t], axis=1),
         jnp.concatenate([-w1im_t, w1re_t], axis=1)], axis=0)   # (2C, 2Cmid)
    b2 = jnp.concatenate(
        [jnp.concatenate([w2re_t, w2im_t], axis=1),
         jnp.concatenate([-w2im_t, w2re_t], axis=1)], axis=0)   # (2Cmid, 2C)

    bt, tile_hw = _pick_tiles(B, C, HW, jnp.dtype(xre.dtype).itemsize)
    chunk = 128 if tile_hw % 128 == 0 else tile_hw
    n_chunks = tile_hw // chunk

    kernel = functools.partial(
        _cca_kernel, inv_hw=1.0 / HW, chunk=chunk, n_chunks=n_chunks, bt=bt)

    out_packed = pl.pallas_call(
        kernel,
        out_shape=jax.ShapeDtypeStruct((B, 1, 2 * C), jnp.float32),
        grid_spec=pltpu.PrefetchScalarGridSpec(
            num_scalar_prefetch=0,
            grid=(B // bt, HW // tile_hw),
            in_specs=[
                pl.BlockSpec((bt, C, tile_hw), lambda b, k: (b, 0, k)),
                pl.BlockSpec((bt, C, tile_hw), lambda b, k: (b, 0, k)),
                # grid-invariant weights (kept double-buffered; tiny anyway)
                pl.BlockSpec((2 * C, 2 * Cmid), lambda b, k: (0, 0)),
                pl.BlockSpec((2 * Cmid, 2 * C), lambda b, k: (0, 0)),
            ],
            out_specs=pl.BlockSpec((bt, 1, 2 * C), lambda b, k: (b, 0, 0)),
            scratch_shapes=[
                pltpu.VMEM((bt, C, chunk), jnp.float32),   # sum re
                pltpu.VMEM((bt, C, chunk), jnp.float32),   # sum im
                pltpu.VMEM((bt, C, chunk), jnp.float32),   # max re
                pltpu.VMEM((bt, C, chunk), jnp.float32),   # max im
            ],
        ),
        compiler_params=pltpu.CompilerParams(
            dimension_semantics=("parallel", "arbitrary"),
            vmem_limit_bytes=48 * 1024 * 1024,
        ),
    )(xre, xim, b1, b2)

    out_re = out_packed[:, 0, :C].reshape(B, C, 1, 1)
    out_im = out_packed[:, 0, C:].reshape(B, C, 1, 1)
    return jax.lax.complex(out_re, out_im)


def _reference(x_re, x_im, w1_re, w1_im, w2_re, w2_im):
    """Pure-JAX reference of the forward pass for validation."""
    def fc(p_re, p_im):
        h_re = jnp.einsum("bc,oc->bo", p_re, w1_re) - jnp.einsum("bc,oc->bo", p_im, w1_im)
        h_im = jnp.einsum("bc,oc->bo", p_im, w1_re) + jnp.einsum("bc,oc->bo", p_re, w1_im)
        h_re = jnp.maximum(h_re, 0.0)
        h_im = jnp.maximum(h_im, 0.0)
        y_re = jnp.einsum("bc,oc->bo", h_re, w2_re) - jnp.einsum("bc,oc->bo", h_im, w2_im)
        y_im = jnp.einsum("bc,oc->bo", h_im, w2_re) + jnp.einsum("bc,oc->bo", h_re, w2_im)
        return y_re, y_im

    avg_re, avg_im = x_re.mean((2, 3)), x_im.mean((2, 3))
    max_re, max_im = x_re.max((2, 3)), x_im.max((2, 3))
    a_re, a_im = fc(avg_re, avg_im)
    m_re, m_im = fc(max_re, max_im)
    s_re, s_im = a_re + m_re, a_im + m_im
    return jax.lax.complex(jax.nn.sigmoid(s_re)[:, :, None, None],
                           jax.nn.sigmoid(s_im)[:, :, None, None])


if __name__ == "__main__":
    B, C, H, W = 2, 4, 16, 16
    reduction_ratio = 2
    Cmid = max(C // reduction_ratio, 1)

    key = jax.random.PRNGKey(0)
    k_xr, k_xi, k_w1r, k_w1i, k_w2r, k_w2i = jax.random.split(key, 6)

    x_re = jax.random.normal(k_xr, (B, C, H, W), dtype=jnp.float32)
    x_im = jax.random.normal(k_xi, (B, C, H, W), dtype=jnp.float32)

    # ComplexConv2d(k=1, bias=False) weights: [out, in, 1, 1] stored as [out, in].
    w1_re = 0.2 * jax.random.normal(k_w1r, (Cmid, C), dtype=jnp.float32)
    w1_im = 0.2 * jax.random.normal(k_w1i, (Cmid, C), dtype=jnp.float32)
    w2_re = 0.2 * jax.random.normal(k_w2r, (C, Cmid), dtype=jnp.float32)
    w2_im = 0.2 * jax.random.normal(k_w2i, (C, Cmid), dtype=jnp.float32)

    out = complex_channel_attention(x_re, x_im, w1_re, w1_im, w2_re, w2_im)
    out = jax.block_until_ready(out)

    ref = _reference(x_re, x_im, w1_re, w1_im, w2_re, w2_im)
    assert out.shape == (B, C, 1, 1), out.shape
    assert jnp.allclose(out, ref, atol=1e-5, rtol=1e-5), "mismatch vs reference"

    print("KERNEL_OK")
</pallas_src>

<mosaic_0001>
module attributes {stable_mosaic.version = 11 : i64} {
  func.func @_cca_kernel(%arg0: i32, %arg1: i32, %arg2: memref<1x4x256xf32, #tpu.memory_space<vmem>>, %arg3: memref<1x4x256xf32, #tpu.memory_space<vmem>>, %arg4: memref<8x4xf32, #tpu.memory_space<vmem>>, %arg5: memref<4x8xf32, #tpu.memory_space<vmem>>, %arg6: memref<1x1x8xf32, #tpu.memory_space<vmem>>, %arg7: memref<1x4x128xf32, #tpu.memory_space<vmem>>, %arg8: memref<1x4x128xf32, #tpu.memory_space<vmem>>, %arg9: memref<1x4x128xf32, #tpu.memory_space<vmem>>, %arg10: memref<1x4x128xf32, #tpu.memory_space<vmem>>) attributes {dimension_semantics = [#tpu.dimension_semantics<parallel>, #tpu.dimension_semantics<arbitrary>], iteration_bounds = array<i64: 2, 1>, scalar_prefetch = 0 : i64, scratch_operands = 4 : i64, tpu.core_type = #tpu.core_type<tc>, window_params = [{transform_indices = @transform_0, window_bounds = array<i64: 1, 4, 256>}, {transform_indices = @transform_1, window_bounds = array<i64: 1, 4, 256>}, {pipeline_mode = #tpu.pipeline_mode<synchronous>, transform_indices = @transform_2, window_bounds = array<i64: 8, 4>}, {pipeline_mode = #tpu.pipeline_mode<synchronous>, transform_indices = @transform_3, window_bounds = array<i64: 4, 8>}, {transform_indices = @transform_4, window_bounds = array<i64: 1, 1, 8>}]} {
    %c0_i32 = arith.constant 0 : i32
    %0 = arith.cmpi eq, %arg1, %c0_i32 : i32
    %1 = arith.extui %0 : i1 to i32
    %c0_i32_0 = arith.constant 0 : i32
    %2 = arith.cmpi ne, %1, %c0_i32_0 : i32
    scf.if %2 {
      %cst = arith.constant 0.000000e+00 : f32
      %26 = vector.broadcast %cst : f32 to vector<1x4x128xf32>
      %c0_37 = arith.constant 0 : index
      %c0_38 = arith.constant 0 : index
      %c0_39 = arith.constant 0 : index
      %27 = vector.load %arg7[%c0_37, %c0_38, %c0_39] : memref<1x4x128xf32, #tpu.memory_space<vmem>>, vector<1x4x128xf32>
      tpu.vector_store %arg7[%c0_37, %c0_38, %c0_39], %26 {strides = array<i32>} : memref<1x4x128xf32, #tpu.memory_space<vmem>>, vector<1x4x128xf32>,
      %cst_40 = arith.constant 0.000000e+00 : f32
      %28 = vector.broadcast %cst_40 : f32 to vector<1x4x128xf32>
      %c0_41 = arith.constant 0 : index
      %c0_42 = arith.constant 0 : index
      %c0_43 = arith.constant 0 : index
      %29 = vector.load %arg8[%c0_41, %c0_42, %c0_43] : memref<1x4x128xf32, #tpu.memory_space<vmem>>, vector<1x4x128xf32>
      tpu.vector_store %arg8[%c0_41, %c0_42, %c0_43], %28 {strides = array<i32>} : memref<1x4x128xf32, #tpu.memory_space<vmem>>, vector<1x4x128xf32>,
      %cst_44 = arith.constant 0xFF800000 : f32
      %30 = vector.broadcast %cst_44 : f32 to vector<1x4x128xf32>
      %c0_45 = arith.constant 0 : index
      %c0_46 = arith.constant 0 : index
      %c0_47 = arith.constant 0 : index
      %31 = vector.load %arg9[%c0_45, %c0_46, %c0_47] : memref<1x4x128xf32, #tpu.memory_space<vmem>>, vector<1x4x128xf32>
      tpu.vector_store %arg9[%c0_45, %c0_46, %c0_47], %30 {strides = array<i32>} : memref<1x4x128xf32, #tpu.memory_space<vmem>>, vector<1x4x128xf32>,
      %cst_48 = arith.constant 0xFF800000 : f32
      %32 = vector.broadcast %cst_48 : f32 to vector<1x4x128xf32>
      %c0_49 = arith.constant 0 : index
      %c0_50 = arith.constant 0 : index
      %c0_51 = arith.constant 0 : index
      %33 = vector.load %arg10[%c0_49, %c0_50, %c0_51] : memref<1x4x128xf32, #tpu.memory_space<vmem>>, vector<1x4x128xf32>
      tpu.vector_store %arg10[%c0_49, %c0_50, %c0_51], %32 {strides = array<i32>} : memref<1x4x128xf32, #tpu.memory_space<vmem>>, vector<1x4x128xf32>,
    } else {
    }
    %c0 = arith.constant 0 : index
    %c0_1 = arith.constant 0 : index
    %c0_2 = arith.constant 0 : index
    %3 = vector.load %arg7[%c0, %c0_1, %c0_2] : memref<1x4x128xf32, #tpu.memory_space<vmem>>, vector<1x4x128xf32>
    %c0_3 = arith.constant 0 : index
    %c0_4 = arith.constant 0 : index
    %c0_5 = arith.constant 0 : index
    %4 = vector.load %arg8[%c0_3, %c0_4, %c0_5] : memref<1x4x128xf32, #tpu.memory_space<vmem>>, vector<1x4x128xf32>
    %c0_6 = arith.constant 0 : index
    %c0_7 = arith.constant 0 : index
    %c0_8 = arith.constant 0 : index
    %5 = vector.load %arg9[%c0_6, %c0_7, %c0_8] : memref<1x4x128xf32, #tpu.memory_space<vmem>>, vector<1x4x128xf32>
    %c0_9 = arith.constant 0 : index
    %c0_10 = arith.constant 0 : index
    %c0_11 = arith.constant 0 : index
    %6 = vector.load %arg10[%c0_9, %c0_10, %c0_11] : memref<1x4x128xf32, #tpu.memory_space<vmem>>, vector<1x4x128xf32>
    %c0_12 = arith.constant 0 : index
    %c0_13 = arith.constant 0 : index
    %c0_14 = arith.constant 0 : index
    %7 = vector.load %arg2[%c0_12, %c0_13, %c0_14] : memref<1x4x256xf32, #tpu.memory_space<vmem>>, vector<1x4x128xf32>
    %c0_15 = arith.constant 0 : index
    %c0_16 = arith.constant 0 : index
    %c0_17 = arith.constant 0 : index
    %8 = vector.load %arg3[%c0_15, %c0_16, %c0_17] : memref<1x4x256xf32, #tpu.memory_space<vmem>>, vector<1x4x128xf32>
    %9 = arith.addf %3, %7 : vector<1x4x128xf32>
    %10 = arith.addf %4, %8 : vector<1x4x128xf32>
    %11 = arith.maximumf %5, %7 : vector<1x4x128xf32>
    %12 = arith.maximumf %6, %8 : vector<1x4x128xf32>
    %c0_18 = arith.constant 0 : index
    %c0_19 = arith.constant 0 : index
    %c128 = arith.constant 128 : index
    %13 = vector.load %arg2[%c0_18, %c0_19, %c128] : memref<1x4x256xf32, #tpu.memory_space<vmem>>, vector<1x4x128xf32>
    %c0_20 = arith.constant 0 : index
    %c0_21 = arith.constant 0 : index
    %c128_22 = arith.constant 128 : index
    %14 = vector.load %arg3[%c0_20, %c0_21, %c128_22] : memref<1x4x256xf32, #tpu.memory_space<vmem>>, vector<1x4x128xf32>
    %15 = arith.addf %9, %13 : vector<1x4x128xf32>
    %16 = arith.addf %10, %14 : vector<1x4x128xf32>
    %17 = arith.maximumf %11, %13 : vector<1x4x128xf32>
    %18 = arith.maximumf %12, %14 : vector<1x4x128xf32>
    %c0_23 = arith.constant 0 : index
    %c0_24 = arith.constant 0 : index
    %c0_25 = arith.constant 0 : index
    %19 = vector.load %arg7[%c0_23, %c0_24, %c0_25] : memref<1x4x128xf32, #tpu.memory_space<vmem>>, vector<1x4x128xf32>
    tpu.vector_store %arg7[%c0_23, %c0_24, %c0_25], %15 {strides = array<i32>} : memref<1x4x128xf32, #tpu.memory_space<vmem>>, vector<1x4x128xf32>,
    %c0_26 = arith.constant 0 : index
    %c0_27 = arith.constant 0 : index
    %c0_28 = arith.constant 0 : index
    %20 = vector.load %arg8[%c0_26, %c0_27, %c0_28] : memref<1x4x128xf32, #tpu.memory_space<vmem>>, vector<1x4x128xf32>
    tpu.vector_store %arg8[%c0_26, %c0_27, %c0_28], %16 {strides = array<i32>} : memref<1x4x128xf32, #tpu.memory_space<vmem>>, vector<1x4x128xf32>,
    %c0_29 = arith.constant 0 : index
    %c0_30 = arith.constant 0 : index
    %c0_31 = arith.constant 0 : index
    %21 = vector.load %arg9[%c0_29, %c0_30, %c0_31] : memref<1x4x128xf32, #tpu.memory_space<vmem>>, vector<1x4x128xf32>
    tpu.vector_store %arg9[%c0_29, %c0_30, %c0_31], %17 {strides = array<i32>} : memref<1x4x128xf32, #tpu.memory_space<vmem>>, vector<1x4x128xf32>,
    %c0_32 = arith.constant 0 : index
    %c0_33 = arith.constant 0 : index
    %c0_34 = arith.constant 0 : index
    %22 = vector.load %arg10[%c0_32, %c0_33, %c0_34] : memref<1x4x128xf32, #tpu.memory_space<vmem>>, vector<1x4x128xf32>
    tpu.vector_store %arg10[%c0_32, %c0_33, %c0_34], %18 {strides = array<i32>} : memref<1x4x128xf32, #tpu.memory_space<vmem>>, vector<1x4x128xf32>,
    %c0_i32_35 = arith.constant 0 : i32
    %23 = arith.cmpi eq, %arg1, %c0_i32_35 : i32
    %24 = arith.extui %23 : i1 to i32
    %c0_i32_36 = arith.constant 0 : i32
    %25 = arith.cmpi ne, %24, %c0_i32_36 : i32
    scf.if %25 {
      %c0_37 = arith.constant 0 : index
      %c0_38 = arith.constant 0 : index
      %c0_39 = arith.constant 0 : index
      %26 = vector.load %arg7[%c0_37, %c0_38, %c0_39] : memref<1x4x128xf32, #tpu.memory_space<vmem>>, vector<1x4x128xf32>
      %cst = arith.constant dense<0.000000e+00> : vector<1x4xf32>
      %27 = vector.multi_reduction <add>, %26, %cst [2] : vector<1x4x128xf32> to vector<1x4xf32>
      %cst_40 = arith.constant 3.906250e-03 : f32
      %28 = vector.broadcast %cst_40 : f32 to vector<1x4xf32>
      %29 = arith.mulf %27, %28 : vector<1x4xf32>
      %c0_41 = arith.constant 0 : index
      %c0_42 = arith.constant 0 : index
      %c0_43 = arith.constant 0 : index
      %30 = vector.load %arg8[%c0_41, %c0_42, %c0_43] : memref<1x4x128xf32, #tpu.memory_space<vmem>>, vector<1x4x128xf32>
      %cst_44 = arith.constant dense<0.000000e+00> : vector<1x4xf32>
      %31 = vector.multi_reduction <add>, %30, %cst_44 [2] : vector<1x4x128xf32> to vector<1x4xf32>
      %cst_45 = arith.constant 3.906250e-03 : f32
      %32 = vector.broadcast %cst_45 : f32 to vector<1x4xf32>
      %33 = arith.mulf %31, %32 : vector<1x4xf32>
      %c0_46 = arith.constant 0 : index
      %c0_47 = arith.constant 0 : index
      %c0_48 = arith.constant 0 : index
      %34 = vector.load %arg9[%c0_46, %c0_47, %c0_48] : memref<1x4x128xf32, #tpu.memory_space<vmem>>, vector<1x4x128xf32>
      %cst_49 = arith.constant dense<0xFF800000> : vector<1x4xf32>
      %35 = vector.multi_reduction <maximumf>, %34, %cst_49 [2] : vector<1x4x128xf32> to vector<1x4xf32>
      %c0_50 = arith.constant 0 : index
      %c0_51 = arith.constant 0 : index
      %c0_52 = arith.constant 0 : index
      %36 = vector.load %arg10[%c0_50, %c0_51, %c0_52] : memref<1x4x128xf32, #tpu.memory_space<vmem>>, vector<1x4x128xf32>
      %cst_53 = arith.constant dense<0xFF800000> : vector<1x4xf32>
      %37 = vector.multi_reduction <maximumf>, %36, %cst_53 [2] : vector<1x4x128xf32> to vector<1x4xf32>
      %38 = tpu.concatenate %29, %33 in 1 : vector<1x4xf32>, vector<1x4xf32> -> vector<1x8xf32>
      %39 = tpu.concatenate %35, %37 in 1 : vector<1x4xf32>, vector<1x4xf32> -> vector<1x8xf32>
      %40 = tpu.concatenate %38, %39 in 0 : vector<1x8xf32>, vector<1x8xf32> -> vector<2x8xf32>
      %c0_54 = arith.constant 0 : index
      %c0_55 = arith.constant 0 : index
      %41 = vector.load %arg4[%c0_54, %c0_55] : memref<8x4xf32, #tpu.memory_space<vmem>>, vector<8x4xf32>
      %cst_56 = arith.constant dense<0.000000e+00> : vector<2x4xf32>
      %42 = tpu.matmul %40, %41, %cst_56 {dimension_numbers = #tpu.dot_dimension_numbers<[1], [0], [0], [1], [0, 0, 1, 1], [], []>} : vector<2x8xf32>, vector<8x4xf32>, vector<2x4xf32> -> vector<2x4xf32>
      %cst_57 = arith.constant 0.000000e+00 : f32
      %43 = vector.broadcast %cst_57 : f32 to vector<2x4xf32>
      %44 = arith.maximumf %42, %43 : vector<2x4xf32>
      %c0_58 = arith.constant 0 : index
      %c0_59 = arith.constant 0 : index
      %45 = vector.load %arg5[%c0_58, %c0_59] : memref<4x8xf32, #tpu.memory_space<vmem>>, vector<4x8xf32>
      %cst_60 = arith.constant dense<0.000000e+00> : vector<2x8xf32>
      %46 = tpu.matmul %44, %45, %cst_60 {dimension_numbers = #tpu.dot_dimension_numbers<[1], [0], [0], [1], [0, 0, 1, 1], [], []>} : vector<2x4xf32>, vector<4x8xf32>, vector<2x8xf32> -> vector<2x8xf32>
      %47 = vector.extract_strided_slice %46 {offsets = [0, 0], sizes = [1, 8], strides = [1, 1]} : vector<2x8xf32> to vector<1x8xf32>
      %48 = vector.extract_strided_slice %46 {offsets = [1, 0], sizes = [1, 8], strides = [1, 1]} : vector<2x8xf32> to vector<1x8xf32>
      %49 = arith.addf %47, %48 : vector<1x8xf32>
      %50 = arith.negf %49 : vector<1x8xf32>
      %51 = math.exp %50 : vector<1x8xf32>
      %cst_61 = arith.constant 1.000000e+00 : f32
      %52 = vector.broadcast %cst_61 : f32 to vector<1x8xf32>
      %53 = arith.addf %52, %51 : vector<1x8xf32>
      %54 = arith.divf %52, %53 : vector<1x8xf32>
      %55 = vector.shape_cast %54 : vector<1x8xf32> to vector<1x1x8xf32>
      %c0_62 = arith.constant 0 : index
      %c0_63 = arith.constant 0 : index
      %c0_64 = arith.constant 0 : index
      %56 = vector.load %arg6[%c0_62, %c0_63, %c0_64] : memref<1x1x8xf32, #tpu.memory_space<vmem>>, vector<1x1x8xf32>
      tpu.vector_store %arg6[%c0_62, %c0_63, %c0_64], %55 {strides = array<i32>} : memref<1x1x8xf32, #tpu.memory_space<vmem>>, vector<1x1x8xf32>,
    } else {
    }
    return
  }
  func.func @transform_0(%arg0: i32, %arg1: i32) -> (i32, i32, i32) {
    %c0_i32 = arith.constant 0 : i32
    %c0_i32_0 = arith.constant 0 : i32
    return %arg0, %c0_i32, %arg1 : i32, i32, i32
  }
  func.func @transform_1(%arg0: i32, %arg1: i32) -> (i32, i32, i32) {
    %c0_i32 = arith.constant 0 : i32
    %c0_i32_0 = arith.constant 0 : i32
    return %arg0, %c0_i32, %arg1 : i32, i32, i32
  }
  func.func @transform_2(%arg0: i32, %arg1: i32) -> (i32, i32) {
    %c0_i32 = arith.constant 0 : i32
    %c0_i32_0 = arith.constant 0 : i32
    %c0_i32_1 = arith.constant 0 : i32
    return %c0_i32, %c0_i32_0 : i32, i32
  }
  func.func @transform_3(%arg0: i32, %arg1: i32) -> (i32, i32) {
    %c0_i32 = arith.constant 0 : i32
    %c0_i32_0 = arith.constant 0 : i32
    %c0_i32_1 = arith.constant 0 : i32
    return %c0_i32, %c0_i32_0 : i32, i32
  }
  func.func @transform_4(%arg0: i32, %arg1: i32) -> (i32, i32, i32) {
    %c0_i32 = arith.constant 0 : i32
    %c0_i32_0 = arith.constant 0 : i32
    %c0_i32_1 = arith.constant 0 : i32
    return %arg0, %c0_i32, %c0_i32_0 : i32, i32, i32
  }
}

</mosaic_0001>

<bundles_post_ra>
// kernel: tpu_custom_call.1
= control target key start
LH: loop header
LB: loop body
LE: loop exit
PB: predicated region body
PF: predicated region fallthrough
CT: control target
= control target key end

     0   :  { %9 = vsyncpa [#allocation7], 0  ;;  %s1163_s0 = inlined_call_operand.hbm [shape: f32[2,4,256], index: 0, kind: input, shape index: {}]   ;;  %s1164_s1 = inlined_call_operand.hbm [shape: f32[2,4,256], index: 1, kind: input, shape index: {}]   ;;  %s1165_s2 = inlined_call_operand.vmem [shape: f32[8,4], index: 2, kind: input, shape index: {}]   ;;  %s1166_s3 = inlined_call_operand.vmem [shape: f32[4,8], index: 3, kind: input, shape index: {}]   ;;  %s1167_s4 = inlined_call_operand.hbm [shape: f32[2,1,8], index: 4, kind: output, shape index: {}]  }
   0x1   :  { %11 = vsyncpa [#allocation7 + $0x1], 0 }
   0x2   :  { %12 = vsyncpa [#allocation10], 0 }
   0x3   :  { %14 = vsyncpa [#allocation10 + $0x1], 0 }
   0x4   :  { %15 = vsyncpa [#allocation8], 0 }
   0x5   :  { %17 = vsyncpa [#allocation8 + $0x1], 0  ;;  %s928_s15 = smov 0   ;;  %s930_s16 = smov 0  }
   0x6   :  { %s932_s17 = smov 0   ;;  %s934_s18 = smov 0  }
   0x7   :  { %s936_s19 = smov 0   ;;  %s938_s20 = smov 0  }
   0x8 LB: > { %s639_s21 = sadd.s32 4294967295, %s895_s20   ;;  %s640_s22 = sadd.s32 4294967294, %s895_s20   ;;  %s895_s20 = sphi %s938_s20, %s23_s20   ;;  %s891_s19 = sphi %s936_s19, %s1187_s19   ;;  %s887_s18 = sphi %s934_s18, %s1186_s18   ;;  %s883_s17 = sphi %s932_s17, %s1185_s17   ;;  %s879_s16 = sphi %s930_s16, %s1184_s16   ;;  %s875_s15 = sphi %s928_s15, %s1183_s15  }
   0x9   : > { %s35_s23 = sadd.s32 1, %s891_s19  ;;  %s44_s24 = sadd.s32 1, %s883_s17 }
   0xa   : > { %p37_p0 = scmp.ge.s32.totalorder %s35_s23, 2  ;;  %p51_p1 = scmp.ne.s32.totalorder %s883_s17, %s879_s16 }
   0xb   : > { %p52_p2 = scmp.eq.s32.totalorder %s895_s20, 0  ;;  %p57_p3 = scmp.ne.s32.totalorder %s879_s16, %s875_s15 }
   0xc   : > { %s1189_s23 = smov (%p37_p0, %s35_s23), 0  ;;  %p58_p5 = scmp.eq.s32.totalorder %s639_s21, 0 }
   0xd   : > { %p969_p4 = por %p52_p2, %p51_p1  ;;  %s39_s26 = ssub.s32 %s891_s19, %s1189_s23 }
   0xe   : > { %p151_p6 = scmp.eq.s32.totalorder %s639_s21, 1  ;;  %p42_p7 = scmp.eq.s32.totalorder %s39_s26, 0 }
   0xf   : > { %p975_p8 = por %p58_p5, %p57_p3  ;;  %p157_p10 = scmp.eq.s32.totalorder %s640_s22, 1 }
  0x10   : > { %p979_p9 = por %p151_p6, %p51_p1  ;;  %p692_p13 = scmp.lt.s32.totalorder %s895_s20, 2 }
  0x11   : > { %s1171_s27 = scalar_select %p975_p8, 1, 0 }
  0x12   : > { %s1172_s28 = scalar_select %p979_p9, 1, 0 }
  0x13   : > { %s984_s29 = scalar_select %p42_p7, %s883_s17, %s44_s24  }
  0x14   : > { %p986_p11 = por %p157_p10, %p57_p3  ;;  %s993_s5 = sand.u32 1, %s883_s17  }
  0x15   : > { %s643_s6 = sshll.u32 %s993_s5, 3  ;;  %s659_s7 = sshll.u32 %s891_s19, 7 }
  0x16   : > { %s1173_s30 = scalar_select %p986_p11, 1, 0 }
  0x17   : > { %s1002_s10 = scalar_lea.hbm %s1163_s0, %s659_s7  ;;  %s187_s11 = scalar_lea.vmem [#allocation6], %s643_s6 }
  0x18   : > { %s197_s12 = sshll.u32 %s187_s11, 4  ;;  %p1010_p0 = pnand %p692_p13, %p969_p4  ;;  %s1006_s12 = int_to_ptr.vmem [resolvable:$true] %s197_s12 }
  0x19   : > { %s184_s14 = scalar_lea.sflag [#allocation7], %s993_s5  ;;  %s749_s21 = scalar_lea.hbm %s1002_s10, 128 }
  0x1a   : > { %p750_p3 = scmp.ne.s32.totalorder %s1002_s10, %s749_s21  ;;  %p751_p5 = pneg %p1010_p0 }
  0x1b   : > { %s754_s25 = scalar_lea.hbm %s1163_s0, 256  ;;  %p755_p4 = scmp.lt.u32.totalorder %s1002_s10, %s1163_s0 }
  0x1c   : > { %p752_p6 = pnand %p751_p5, %p750_p3  ;;  %p756_p10 = scmp.lt.u32.totalorder %s754_s25, %s749_s21 }
  0x1d   : > { %p758_p12 = scmp.lt.u32.totalorder %s749_s21, %s1002_s10 }
  0x1e   : > { %p753_p7 = pneg %p752_p6  ;;  %p757_p13 = por %p756_p10, %p755_p4 }
  0x20   : > { %p759_p1 = por %p758_p12, %p757_p13 }
  0x22   : > { %p760_p2 = pnand %p759_p1, %p753_p7 }
  0x24   : > { %763 = shalt.err (!%p760_p2)
}
  0x25   : > { %s764_s9 = scalar_lea.vmem %s1006_s12, 128  ;;  %s897_s11 = smov [#allocation6]  }
  0x26   : > { %p765_p3 = scmp.ne.s32.totalorder %s1006_s12, %s764_s9  ;;  %s769_s22 = sshll.u32 %s897_s11, 4  ;;  %s770_s22 = int_to_ptr.vmem [resolvable:$false] %s769_s22 }
  0x27   : > { %s771_s24 = scalar_lea.vmem %s770_s22, 256  ;;  %p772_p9 = scmp.lt.s32.totalorder %s1006_s12, %s770_s22 }
  0x28   : > { %p767_p6 = pnand %p765_p3, %p751_p5  ;;  %p773_p4 = scmp.lt.s32.totalorder %s771_s24, %s764_s9 }
  0x2a   : > { %p768_p11 = pneg %p767_p6  ;;  %p774_p10 = por %p773_p4, %p772_p9 }
  0x2c   : > { %p775_p12 = pnand %p774_p10, %p768_p11 }
  0x2e   : > { %778 = shalt.err (!%p775_p12)
}
  0x2f   : > { %684 = dma.hbm_to_vmem [thread:$0]  (!%p1010_p0), %s1002_s10, 128, %s1006_s12, %s184_s14  }
  0x30   : > { %p1175_p1 = scmp.lt.s32.totalorder %s895_s20, 3  ;;  %p1176_p2 = scmp.ge.s32.totalorder %s895_s20, 1 }
  0x31   : > { %s1055_s8 = scalar_lea.hbm %s1164_s1, %s659_s7  ;;  %s208_s9 = scalar_lea.vmem [#allocation9], %s643_s6 }
  0x32   : > { %p1046_p7 = pnand %p1176_p2, %p1175_p1  ;;  %s218_s11 = sshll.u32 %s208_s9, 4  ;;  %s219_s11 = int_to_ptr.vmem [resolvable:$true] %s218_s11 }
  0x33   : > { %s205_s10 = scalar_lea.sflag [#allocation10], %s993_s5  ;;  %s779_s12 = scalar_lea.hbm %s1055_s8, 128 }
  0x34   : > { %s1177_s21 = scalar_select %p1046_p7, 1, 0 }
  0x35   : > { %p780_p9 = scmp.ne.s32.totalorder %s1055_s8, %s779_s12  ;;  %s784_s7 = scalar_lea.hbm %s1164_s1, 256 }
  0x36   : > { %p785_p3 = scmp.lt.u32.totalorder %s1055_s8, %s1164_s1  ;;  %p786_p6 = scmp.lt.u32.totalorder %s784_s7, %s779_s12 }
  0x37   : > { %p782_p11 = pnand %p780_p9, %p751_p5  ;;  %p788_p10 = scmp.lt.u32.totalorder %s779_s12, %s1055_s8 }
  0x38   : > { %p787_p4 = por %p786_p6, %p785_p3 }
  0x39   : > { %p783_p13 = pneg %p782_p11 }
  0x3a   : > { %p789_p12 = por %p788_p10, %p787_p4 }
  0x3c   : > { %p790_p1 = pnand %p789_p12, %p783_p13 }
  0x3e   : > { %793 = shalt.err (!%p790_p1)
}
  0x3f   : > { %s794_s5 = scalar_lea.vmem %s219_s11, 128  ;;  %s898_s6 = smov [#allocation9]  }
  0x40   : > { %p795_p2 = scmp.ne.s32.totalorder %s219_s11, %s794_s5  ;;  %s799_s26 = sshll.u32 %s898_s6, 4  ;;  %s800_s26 = int_to_ptr.vmem [resolvable:$false] %s799_s26 }
  0x41   : > { %s801_s9 = scalar_lea.vmem %s800_s26, 256  ;;  %p802_p8 = scmp.lt.s32.totalorder %s219_s11, %s800_s26 }
  0x42   : > { %p797_p9 = pnand %p795_p2, %p751_p5  ;;  %p803_p7 = scmp.lt.s32.totalorder %s801_s9, %s794_s5 }
  0x44   : > { %p798_p11 = pneg %p797_p9  ;;  %p804_p3 = por %p803_p7, %p802_p8 }
  0x46   : > { %p805_p6 = pnand %p804_p3, %p798_p11 }
  0x48   : > { %808 = shalt.err (!%p805_p6)
}
  0x49   : > { %687 = dma.hbm_to_vmem [thread:$0]  (!%p1010_p0), %s1055_s8, 128, %s219_s11, %s205_s10  }
  0x4a   : > { %p1178_p13 = scmp.ne.s32.totalorder %s1177_s21, 0 }
  0x4b   : > { %s1082_s12 = sand.u32 (!%p1178_p13), 1, %s879_s16   ;;  %p1179_p5 = scmp.ne.s32.totalorder (!%p1178_p13), %s1171_s27, 0 }
  0x4c   : > { %227 = sbr.rel (%p1178_p13) target bundleno = 731 (0x2db), region = 36  ;;  %s650_s14 = sshll.u32 (!%p1178_p13), %s1082_s12, 3 }
  0x4d   : > { %s230_s22 = scalar_lea.sflag (!%p1178_p13), [#allocation7], %s1082_s12  ;;  %s233_s7 = scalar_lea.vmem (!%p1178_p13), [#allocation6], %s650_s14 }
  0x53   : > { %862 = dma.done.wait (%p1179_p5), %s230_s22, 128  }
  0x54   : > { %864 = vsyncadd (%p1179_p5), %s230_s22, 4294967168  ;;  %s239_s13 = scalar_lea.sflag [#allocation10], %s1082_s12  ;;  %s242_s8 = scalar_lea.vmem [#allocation9], %s650_s14 }
  0x55   : > { %866 = dma.done.wait (%p1179_p5), %s239_s13, 128  }
  0x56   : > { %868 = vsyncadd (%p1179_p5), %s239_s13, 4294967168  ;;  %v899_v0 = vmov -inf   ;;  %v900_v1 = vmov 0.0   ;;  %v285_v2 = vld [vmem:[%s233_s7] sm:$0xf]  ;;  %vm305_vm0 = vcmask 1043456   ;;  %v324_v27 = vlaneseq }
  0x57   : > { %279 = vst [vmem:[#allocation4] sm:$0xf] %v899_v0  ;;  %280 = vst [vmem:[#allocation5] sm:$0xf] %v899_v0  ;;  %665 = vmatprep.subr.mxu0 %v900_v1  ;;  %670 = vmatprep.subr.mxu1 %v900_v1  ;;  %v291_v3 = vld [vmem:[%s233_s7 + $0x4] sm:$0xf] }
  0x58   : > { %277 = vst [vmem:[#allocation2] sm:$0xf] %v900_v1  ;;  %278 = vst [vmem:[#allocation3] sm:$0xf] %v900_v1  ;;  %v286_v4 = vld [vmem:[%s242_s8] sm:$0xf] }
  0x59   : > { %v292_v11 = vld [vmem:[%s242_s8 + $0x4] sm:$0xf]  ;;  %vm901_vm1 = vmmov 0   ;;  %v325_v28 = vand.u32 127, %v324_v27  ;;  %v327_v29 = vshrl.u32 %v324_v27, 7  ;;  %vm338_vm2 = vcmask 31744  }
  0x5a   : > { %v358_v26 = vld [vmem:[%s1165_s2] sm:$0xff]  ;;  %667 = vmatprep.mubr.msk.f32.mxu0 %vm901_vm1, %v900_v1  ;;  %672 = vmatprep.mubr.msk.f32.mxu1 %vm901_vm1, %v900_v1  ;;  %vm356_vm3 = vcmask 1040384   ;;  %vm359_vm4 = vcmask 64512   ;;  %s656_s24 = sshll.u32 %s887_s18, 4  ;;  %s270_s25 = scalar_lea.vmem [#allocation11], %s1082_s12  ;;  %vm521_vm5 = vcmask 57344  }
  0x5b   : > { %666 = vmatpush3.msra.mxu0 %v358_v26  ;;  %v332_v30 = vadd.s32 4294967292, %v325_v28  ;;  %v328_v33 = vsub.s32 %v325_v28, %v327_v29  ;;  %v434_v47 = vld [vmem:[%s1166_s3] sm:$0xf]  ;;  %s536_s5 = sshll.u32 %s270_s25, 4  ;;  %s1114_s9 = scalar_lea.hbm %s1167_s4, %s656_s24  ;;  %s1116_s5 = int_to_ptr.vmem [resolvable:$true] %s536_s5 }
  0x5c   : > { %671 = vmatpush3.msk.msra.mxu1 %vm305_vm0, %v434_v47  ;;  %s524_s14 = scalar_lea.sflag [#allocation8], %s1082_s12  ;;  %s809_s22 = scalar_lea.vmem %s1116_s5, 16 }
  0x5d   : > { %v335_v34 = vsub.s32 %v332_v30, %v327_v29  ;;  %p810_p8 = scmp.ne.s32.totalorder %s1116_s5, %s809_s22  ;;  %p1180_p0 = scmp.ne.s32.totalorder %s1172_s28, 0 }
  0x5e   : > { %v283_v5 = vld [vmem:[#allocation4] sm:$0xf]  ;;  %v284_v7 = vld [vmem:[#allocation5] sm:$0xf]  ;;  %s902_s18 = smov [#allocation11]  }
  0x5f   : > { %v281_v6 = vld [vmem:[#allocation2] sm:$0xf]  ;;  %v289_v8 = vmax.f32 %v283_v5, %v285_v2  ;;  %v290_v10 = vmax.f32 %v284_v7, %v286_v4  ;;  %v282_v12 = vld [vmem:[#allocation3] sm:$0xf]  ;;  %p811_p7 = pnand %p810_p8, %p1180_p0  ;;  %s813_s7 = sshll.u32 %s902_s18, 4  ;;  %s814_s7 = int_to_ptr.vmem [resolvable:$false] %s813_s7 }
  0x60   : > { %v287_v9 = vadd.f32 %v285_v2, %v281_v6  ;;  %v288_v13 = vadd.f32 %v286_v4, %v282_v12  ;;  %s815_s13 = scalar_lea.vmem %s814_s7, 32  ;;  %p816_p10 = scmp.lt.s32.totalorder %s1116_s5, %s814_s7 }
  0x61   : > { %v295_v14 = vmax.f32 %v289_v8, %v291_v3  ;;  %v296_v16 = vmax.f32 %v290_v10, %v292_v11  ;;  %p812_p4 = pneg %p811_p7  ;;  %p817_p12 = scmp.lt.s32.totalorder %s815_s13, %s809_s22 }
  0x62   : > { %v293_v15 = vadd.f32 %v291_v3, %v287_v9  ;;  %v294_v17 = vadd.f32 %v292_v11, %v288_v13 }
  0x63   : > { %299 = vst [vmem:[#allocation4] sm:$0xf] %v295_v14  ;;  %300 = vst [vmem:[#allocation5] sm:$0xf] %v296_v16  ;;  %p818_p1 = por %p817_p12, %p816_p10 }
  0x64   : > { %297 = vst [vmem:[#allocation2] sm:$0xf] %v293_v15  ;;  %298 = vst [vmem:[#allocation3] sm:$0xf] %v294_v17 }
  0x65   : > { %p819_p2 = pnand %p818_p1, %p812_p4 }
  0x6a   : > { %v315_v18 = vld [vmem:[#allocation4] sm:$0xf]  ;;  %v319_v20 = vld [vmem:[#allocation5] sm:$0xf] }
  0x6b   : > { %v304_v19 = vld [vmem:[#allocation2] sm:$0xf]  ;;  %v316_v21 = vsel %vm305_vm0, %v315_v18, -inf  ;;  %v310_v23 = vld [vmem:[#allocation3] sm:$0xf]  ;;  %v320_v24 = vsel %vm305_vm0, %v319_v20, -inf }
  0x6c   : > { %v306_v22 = vsel %vm305_vm0, %v304_v19, 0.0  ;;  %317 = vmax.xlane.f32.xlu1 %v316_v21  ;;  %v311_v25 = vsel %vm305_vm0, %v310_v23, 0.0 }
  0x6d   : > { %307 = vadd.xlane.f32.xlu0 %v306_v22 }
  0x70   : > { %321 = vmax.xlane.f32.xlu1 %v320_v24 }
  0x71   : > { %312 = vadd.xlane.f32.xlu0 %v311_v25 }
  0xf9   : > { %v318_v31 = vpop.xlane.xlu1 %317 }
  0xfa   : > { %v308_v32 = vpop.xlane.xlu0 %307  ;;  %v344_v38 = vrot.slane %v318_v31, %v328_v33 }
  0xfb   : > { %v309_v35 = vmul.f32 0.00390625, %v308_v32 }
  0xfd   : > { %v322_v36 = vpop.xlane.xlu1 %321  ;;  %v329_v41 = vrot.slane %v309_v35, %v328_v33 }
  0xfe   : > { %v313_v37 = vpop.xlane.xlu0 %312  ;;  %v350_v39 = vrot.slane %v322_v36, %v335_v34 }
  0xff   : > { %v314_v40 = vmul.f32 0.00390625, %v313_v37 }
 0x100   : > { %v352_v42 = vsel %vm338_vm2, %v344_v38, %v350_v39 }
 0x101   : > { %v336_v43 = vrot.slane %v314_v40, %v335_v34  ;;  %v354_v44 = vrot.slane %v352_v42, 7 }
 0x103   : > { %v339_v45 = vsel %vm338_vm2, %v329_v41, %v336_v43 }
 0x104   : > { %v357_v46 = vsel %vm356_vm3, %v339_v45, %v354_v44 }
 0x105   : > { %668 = vmatmul.mubr.msk.f32.vlgmr.msra.gmra.mrb[0].mxu0 %vm359_vm4, %v357_v46 }
 0x1d8   : > { %v429_v48 = vpop.f32.mrb[0].mxu0 }
 0x1d9   : > { %v433_v49 = vmax.f32 %v429_v48, 0.0  ;;  %v669_v50 = vpop.f32.mrb[1].mxu0 }
 0x1db   : > { %673 = vmatmul.mubr.msk.f32.vlgmr.msra.gmra.mrb[0].mxu1 %vm338_vm2, %v433_v49 }
 0x2ae   : > { %v507_v51 = vpop.f32.mrb[0].mxu1 }
 0x2af   : > { %v512_v52 = vrot.slane %v507_v51, 1  ;;  %v674_v53 = vpop.f32.mrb[1].mxu1 }
 0x2b1   : > { %v514_v54 = vadd.f32 %v512_v52, %v507_v51 }
 0x2b3   : > { %v655_v55 = vmul.f32 -1.442695, %v514_v54 }
 0x2b5   : > { %745 = vpow2.f32 %v655_v55 }
 0x2bf   : > { %v746_v56 = vpop.eup %745 }
 0x2c0   : > { %v518_v57 = vadd.f32 1.0, %v746_v56 }
 0x2c2   : > { %747 = vrcp.f32 %v518_v57 }
 0x2cc   : > { %v748_v58 = vpop.eup %747 }
 0x2cd   : > { %522 = vst.msk [vmem:[%s270_s25] sm:$0x1] %vm521_vm5, %v748_v58 }
 0x2ce   : > { %822 = shalt.err (!%p819_p2)
}
 0x2cf   : > { %s823_s12 = scalar_lea.hbm %s1114_s9, 16  ;;  %s827_s21 = scalar_lea.hbm %s1167_s4, 32 }
 0x2d0   : > { %p824_p9 = scmp.ne.s32.totalorder %s1114_s9, %s823_s12  ;;  %p828_p6 = scmp.lt.u32.totalorder %s1114_s9, %s1167_s4 }
 0x2d1   : > { %p829_p13 = scmp.lt.u32.totalorder %s827_s21, %s823_s12  ;;  %p831_p8 = scmp.lt.u32.totalorder %s823_s12, %s1114_s9 }
 0x2d2   : > { %p825_p11 = pnand %p824_p9, %p1180_p0 }
 0x2d3   : > { %p830_p5 = por %p829_p13, %p828_p6 }
 0x2d4   : > { %p826_p3 = pneg %p825_p11 }
 0x2d5   : > { %p832_p7 = por %p831_p8, %p830_p5 }
 0x2d7   : > { %p833_p4 = pnand %p832_p7, %p826_p3 }
 0x2d9   : > { %836 = shalt.err (!%p833_p4)
}
 0x2da   : > { %679 = dma.vmem_to_hbm [thread:$0]  (%p1180_p0), %s1116_s5, 16, %s1114_s9, %s524_s14  }
 0x2db PF: > { %s548_s24 = sand.u32 1, %s875_s15   ;;  %p1181_p10 = scmp.ne.s32.totalorder %s1173_s30, 0 }
 0x2dc   : > { %p1182_p12 = scmp.ge.s32.totalorder %s895_s20, 2  ;;  %s549_s25 = scalar_lea.sflag [#allocation8], %s548_s24 }
 0x2de   : > { %p689_p1 = pnand %p1182_p12, %p1181_p10 }
 0x2e0   : > { %870 = dma.done.wait (!%p689_p1), %s549_s25, 16  }
 0x2e1   : > { %872 = vsyncadd (!%p689_p1), %s549_s25, 4294967280  ;;  %s23_s20 = sadd.s32 1, %s895_s20   ;;  %s1183_s15 = smov %s879_s16 }
 0x2e2   : > { %p20_p2 = scmp.ge.s32.totalorder %s23_s20, 4   ;;  %s1184_s16 = smov %s883_s17 }
 0x2e3   : > { %s1185_s17 = smov %s984_s29  ;;  %s1186_s18 = smov %s891_s19 }
 0x2e4   : > { %s1187_s19 = smov %s1189_s23  ;;  %22 = sbr.rel (!%p20_p2) target bundleno = 8 (0x8), region = 102 }
 0x2eb   :  { %553 = vsyncpa [#allocation7], 1 }
 0x2ec   :  { %555 = vsyncpa [#allocation7 + $0x1], 1 }
 0x2ed   :  { %556 = vsyncpa [#allocation10], 1 }
 0x2ee   :  { %558 = vsyncpa [#allocation10 + $0x1], 1 }
 0x2ef   :  { %559 = vsyncpa [#allocation8], 1 }
 0x2f0   :  { %561 = vsyncpa [#allocation8 + $0x1], 1 }

</bundles_post_ra>
